<compile_context>
chip_gen: v5e
topology: v5e:2x2
jax: 0.10.0
libtpu: 0.0.40
codegen_flags: <defaults>
</compile_context>

<pallas_src>
import jax
import jax.numpy as jnp
from jax.experimental import pallas as pl
from jax.experimental.pallas import tpu as pltpu


def _ssa_kernel(p_ref, x_ref, o_ref):
    """p_ref: (half, 2)  col 0 = weight, col 1 = bias; rows [0, half/2) hold the
              r-parity-sliced max-branch params, rows [half/2, half) the
              avg-branch params.
       x_ref, o_ref: (TB, TG, half, HW)."""
    half = x_ref.shape[2]
    half2 = half // 2

    x = x_ref[...].astype(jnp.float32)
    xa = x[:, :, :half2, :]                         # "x1" channels of each slab
    xb = x[:, :, half2:, :]                         # "x2" channels of each slab

    mean_a = jnp.mean(xa, axis=-1, keepdims=True)   # (TB, TG, half2, 1)
    max_b = jnp.max(xb, axis=-1, keepdims=True)     # (TB, TG, half2, 1)

    p = p_ref[...].astype(jnp.float32)
    w_max = p[:half2, 0:1]                          # (half2, 1) -> broadcasts
    b_max = p[:half2, 1:2]
    w_avg = p[half2:, 0:1]
    b_avg = p[half2:, 1:2]

    scale_a = jax.nn.sigmoid(w_max * max_b + b_max)   # scales the x1 channels
    scale_b = jax.nn.sigmoid(w_avg * mean_a + b_avg)  # scales the x2 channels

    o_ref[:, :, :half2, :] = (xa * scale_a).astype(o_ref.dtype)
    o_ref[:, :, half2:, :] = (xb * scale_b).astype(o_ref.dtype)


def _largest_divisor_under(n, unit_bytes, budget_bytes):
    """Largest divisor t of n (>= 1) with t * unit_bytes <= budget_bytes."""
    best = 1
    for t in range(1, n + 1):
        if n % t == 0 and t * unit_bytes <= budget_bytes:
            best = t
    return best


def spatial_shuffle_attention(x, w_max, b_max, w_avg, b_avg, groups,
                              block_budget_bytes=4 * 1024 * 1024):
    """Pallas-backed SSA forward. x: (B, C, H, W); params: (1, C//(2*groups), 1, 1)."""
    b, c, h, w = x.shape
    assert c % groups == 0, "C must be divisible by groups"
    cg = c // groups
    assert cg % 2 == 0, "C // groups must be even"
    half = cg // 2
    hw = h * w
    assert groups % 2 == 0, "groups must be even for the fused-shuffle layout"
    assert half % 2 == 0, "C // (2*groups) must be even for the fused-shuffle layout"
    assert hw % 128 == 0, "H*W must be a multiple of 128 for lane-dense output blocks"

    g2 = groups // 2

    # Pack the four (half,) parameter vectors into one (2, half, 2) array,
    # pre-sliced by channel parity r so the kernel needs no reindexing.
    wm = w_max.reshape(half).astype(x.dtype)
    bm = b_max.reshape(half).astype(x.dtype)
    wa = w_avg.reshape(half).astype(x.dtype)
    ba = b_avg.reshape(half).astype(x.dtype)
    rows = []
    for r in range(2):
        w_r = jnp.concatenate([wm[r::2], wa[r::2]])        # (half,)
        b_r = jnp.concatenate([bm[r::2], ba[r::2]])        # (half,)
        rows.append(jnp.stack([w_r, b_r], axis=-1))        # (half, 2)
    params = jnp.stack(rows, axis=0)                       # (2, half, 2)

    # Tile sizes: pack several (group, r) slabs / batch items per grid step.
    itemsize = jnp.dtype(x.dtype).itemsize
    slab_bytes = half * hw * itemsize
    tg = _largest_divisor_under(g2, slab_bytes, block_budget_bytes)
    tb = _largest_divisor_under(b, tg * slab_bytes, block_budget_bytes)

    # Input viewed as (b, gh, gl, r, q, hw); output produced in final memory order.
    x6 = x.reshape(b, 2, g2, 2, half, hw)
    out_shape = jax.ShapeDtypeStruct((b, g2, half, 4 * hw), x.dtype)

    grid = (b // tb, g2 // tg, 2, 2)                       # (ib, il, ih, ir)

    param_spec = pl.BlockSpec((None, half, 2),
                              lambda ib, il, ih, ir: (ir, 0, 0))
    x_spec = pl.BlockSpec((tb, None, tg, None, half, hw),
                          lambda ib, il, ih, ir: (ib, ih, il, ir, 0, 0))
    out_spec = pl.BlockSpec((tb, tg, half, hw),
                            lambda ib, il, ih, ir: (ib, il, 0, 2 * ir + ih))

    out = pl.pallas_call(
        _ssa_kernel,
        out_shape=out_shape,
        grid=grid,
        in_specs=[param_spec, x_spec],
        out_specs=out_spec,
        compiler_params=pltpu.CompilerParams(
            dimension_semantics=("parallel", "parallel", "parallel", "parallel"),
            vmem_limit_bytes=64 * 1024 * 1024,
        ),
    )(params, x6)

    # Free reshape: (b, g2, half, 4, h, w) row-major == final channel order.
    return out.reshape(b, c, h, w)


def _channel_shuffle(x, groups):
    b, c, h, w = x.shape
    cpg = c // groups
    x = x.reshape(b, groups, cpg, h, w)
    x = jnp.transpose(x, (0, 2, 1, 3, 4))
    return x.reshape(b, c, h, w)


def reference_forward(x, w_max, b_max, w_avg, b_avg, groups):
    """Pure-JAX port of the PyTorch forward (eval-mode dropout)."""
    b, c, h, w = x.shape
    half = c // (2 * groups)
    xg = x.reshape(b * groups, c // groups, h, w)
    xg = _channel_shuffle(xg, 2)
    x1 = xg[:, :half]
    x2 = xg[:, half:]
    avg = jnp.mean(x1, axis=(2, 3), keepdims=True)
    mx = jnp.max(x2, axis=(2, 3), keepdims=True)
    att_avg = w_avg * avg + b_avg
    att_max = w_max * mx + b_max
    att = jax.nn.sigmoid(jnp.concatenate([att_max, att_avg], axis=1))
    xg = xg * att
    out = xg.reshape(b, c, h, w)
    return _channel_shuffle(out, 2)


if __name__ == "__main__":
    B, DIM, GROUPS, H, W = 2, 32, 4, 16, 16
    half = DIM // (2 * GROUPS)

    key = jax.random.PRNGKey(0)
    kx, kwm, kwa = jax.random.split(key, 3)
    x = jax.random.normal(kx, (B, DIM, H, W), dtype=jnp.float32)

    # Small non-zero weights so the reduction path is actually exercised
    # (PyTorch default init is zeros for weights / ones for biases).
    w_max = 0.1 * jax.random.normal(kwm, (1, half, 1, 1), dtype=jnp.float32)
    b_max = jnp.ones((1, half, 1, 1), dtype=jnp.float32)
    w_avg = 0.1 * jax.random.normal(kwa, (1, half, 1, 1), dtype=jnp.float32)
    b_avg = jnp.ones((1, half, 1, 1), dtype=jnp.float32)

    fwd = jax.jit(spatial_shuffle_attention, static_argnums=(5,))
    out = fwd(x, w_max, b_max, w_avg, b_avg, GROUPS)
    out = jax.block_until_ready(out)

    ref = reference_forward(x, w_max, b_max, w_avg, b_avg, GROUPS)
    assert out.shape == (B, DIM, H, W)
    assert jnp.allclose(out, ref, atol=1e-5, rtol=1e-5), "mismatch vs reference"

    print("KERNEL_OK")
</pallas_src>

<mosaic_0001>
module attributes {stable_mosaic.version = 11 : i64} {
  func.func @_ssa_kernel(%arg0: i32, %arg1: i32, %arg2: i32, %arg3: i32, %arg4: memref<1x4x2xf32, #tpu.memory_space<vmem>>, %arg5: memref<2x1x2x1x4x256xf32, #tpu.memory_space<vmem>>, %arg6: memref<2x2x4x256xf32, #tpu.memory_space<vmem>>) attributes {dimension_semantics = [#tpu.dimension_semantics<parallel>, #tpu.dimension_semantics<parallel>, #tpu.dimension_semantics<parallel>, #tpu.dimension_semantics<parallel>], iteration_bounds = array<i64: 1, 1, 2, 2>, scalar_prefetch = 0 : i64, scratch_operands = 0 : i64, tpu.core_type = #tpu.core_type<tc>, window_params = [{transform_indices = @transform_0, window_bounds = array<i64: 1, 4, 2>}, {transform_indices = @transform_1, window_bounds = array<i64: 2, 1, 2, 1, 4, 256>}, {transform_indices = @transform_2, window_bounds = array<i64: 2, 2, 4, 256>}]} {
    %c0 = arith.constant 0 : index
    %c0_0 = arith.constant 0 : index
    %c0_1 = arith.constant 0 : index
    %c0_2 = arith.constant 0 : index
    %c0_3 = arith.constant 0 : index
    %c0_4 = arith.constant 0 : index
    %0 = vector.load %arg5[%c0, %c0_0, %c0_1, %c0_2, %c0_3, %c0_4] : memref<2x1x2x1x4x256xf32, #tpu.memory_space<vmem>>, vector<2x1x2x1x4x256xf32>
    %1 = vector.shape_cast %0 : vector<2x1x2x1x4x256xf32> to vector<2x2x4x256xf32>
    %2 = vector.extract_strided_slice %1 {offsets = [0, 0, 0, 0], sizes = [2, 2, 2, 256], strides = [1, 1, 1, 1]} : vector<2x2x4x256xf32> to vector<2x2x2x256xf32>
    %3 = vector.extract_strided_slice %1 {offsets = [0, 0, 2, 0], sizes = [2, 2, 2, 256], strides = [1, 1, 1, 1]} : vector<2x2x4x256xf32> to vector<2x2x2x256xf32>
    %cst = arith.constant dense<0.000000e+00> : vector<2x2x2xf32>
    %4 = vector.multi_reduction <add>, %2, %cst [3] : vector<2x2x2x256xf32> to vector<2x2x2xf32>
    %5 = vector.shape_cast %4 : vector<2x2x2xf32> to vector<2x2x2x1xf32>
    %cst_5 = arith.constant 2.560000e+02 : f32
    %6 = vector.broadcast %cst_5 : f32 to vector<2x2x2x1xf32>
    %7 = arith.divf %5, %6 : vector<2x2x2x1xf32>
    %cst_6 = arith.constant dense<0xFF800000> : vector<2x2x2xf32>
    %8 = vector.multi_reduction <maximumf>, %3, %cst_6 [3] : vector<2x2x2x256xf32> to vector<2x2x2xf32>
    %9 = vector.shape_cast %8 : vector<2x2x2xf32> to vector<2x2x2x1xf32>
    %c0_7 = arith.constant 0 : index
    %c0_8 = arith.constant 0 : index
    %c0_9 = arith.constant 0 : index
    %10 = vector.load %arg4[%c0_7, %c0_8, %c0_9] : memref<1x4x2xf32, #tpu.memory_space<vmem>>, vector<1x4x2xf32>
    %11 = vector.shape_cast %10 : vector<1x4x2xf32> to vector<4x2xf32>
    %12 = vector.extract_strided_slice %11 {offsets = [0, 0], sizes = [2, 1], strides = [1, 1]} : vector<4x2xf32> to vector<2x1xf32>
    %13 = vector.extract_strided_slice %11 {offsets = [0, 1], sizes = [2, 1], strides = [1, 1]} : vector<4x2xf32> to vector<2x1xf32>
    %14 = vector.extract_strided_slice %11 {offsets = [2, 0], sizes = [2, 1], strides = [1, 1]} : vector<4x2xf32> to vector<2x1xf32>
    %15 = vector.extract_strided_slice %11 {offsets = [2, 1], sizes = [2, 1], strides = [1, 1]} : vector<4x2xf32> to vector<2x1xf32>
    %16 = vector.shape_cast %12 : vector<2x1xf32> to vector<1x1x2x1xf32>
    %17 = vector.broadcast %16 : vector<1x1x2x1xf32> to vector<2x2x2x1xf32>
    %18 = arith.mulf %17, %9 : vector<2x2x2x1xf32>
    %19 = vector.shape_cast %13 : vector<2x1xf32> to vector<1x1x2x1xf32>
    %20 = vector.broadcast %19 : vector<1x1x2x1xf32> to vector<2x2x2x1xf32>
    %21 = arith.addf %18, %20 : vector<2x2x2x1xf32>
    %22 = arith.negf %21 : vector<2x2x2x1xf32>
    %23 = math.exp %22 : vector<2x2x2x1xf32>
    %cst_10 = arith.constant 1.000000e+00 : f32
    %24 = vector.broadcast %cst_10 : f32 to vector<2x2x2x1xf32>
    %25 = arith.addf %24, %23 : vector<2x2x2x1xf32>
    %26 = arith.divf %24, %25 : vector<2x2x2x1xf32>
    %27 = vector.shape_cast %14 : vector<2x1xf32> to vector<1x1x2x1xf32>
    %28 = vector.broadcast %27 : vector<1x1x2x1xf32> to vector<2x2x2x1xf32>
    %29 = arith.mulf %28, %7 : vector<2x2x2x1xf32>
    %30 = vector.shape_cast %15 : vector<2x1xf32> to vector<1x1x2x1xf32>
    %31 = vector.broadcast %30 : vector<1x1x2x1xf32> to vector<2x2x2x1xf32>
    %32 = arith.addf %29, %31 : vector<2x2x2x1xf32>
    %33 = arith.negf %32 : vector<2x2x2x1xf32>
    %34 = math.exp %33 : vector<2x2x2x1xf32>
    %cst_11 = arith.constant 1.000000e+00 : f32
    %35 = vector.broadcast %cst_11 : f32 to vector<2x2x2x1xf32>
    %36 = arith.addf %35, %34 : vector<2x2x2x1xf32>
    %37 = arith.divf %35, %36 : vector<2x2x2x1xf32>
    %38 = vector.broadcast %26 : vector<2x2x2x1xf32> to vector<2x2x2x256xf32>
    %39 = arith.mulf %2, %38 : vector<2x2x2x256xf32>
    %c0_12 = arith.constant 0 : index
    %c0_13 = arith.constant 0 : index
    %c0_14 = arith.constant 0 : index
    %c0_15 = arith.constant 0 : index
    %40 = vector.load %arg6[%c0_12, %c0_13, %c0_14, %c0_15] : memref<2x2x4x256xf32, #tpu.memory_space<vmem>>, vector<2x2x2x256xf32>
    tpu.vector_store %arg6[%c0_12, %c0_13, %c0_14, %c0_15], %39 {strides = array<i32>} : memref<2x2x4x256xf32, #tpu.memory_space<vmem>>, vector<2x2x2x256xf32>,
    %41 = vector.broadcast %37 : vector<2x2x2x1xf32> to vector<2x2x2x256xf32>
    %42 = arith.mulf %3, %41 : vector<2x2x2x256xf32>
    %c0_16 = arith.constant 0 : index
    %c0_17 = arith.constant 0 : index
    %c2 = arith.constant 2 : index
    %c0_18 = arith.constant 0 : index
    %43 = vector.load %arg6[%c0_16, %c0_17, %c2, %c0_18] : memref<2x2x4x256xf32, #tpu.memory_space<vmem>>, vector<2x2x2x256xf32>
    tpu.vector_store %arg6[%c0_16, %c0_17, %c2, %c0_18], %42 {strides = array<i32>} : memref<2x2x4x256xf32, #tpu.memory_space<vmem>>, vector<2x2x2x256xf32>,
    return
  }
  func.func @transform_0(%arg0: i32, %arg1: i32, %arg2: i32, %arg3: i32) -> (i32, i32, i32) {
    %c0_i32 = arith.constant 0 : i32
    %c0_i32_0 = arith.constant 0 : i32
    %c0_i32_1 = arith.constant 0 : i32
    return %arg3, %c0_i32, %c0_i32_0 : i32, i32, i32
  }
  func.func @transform_1(%arg0: i32, %arg1: i32, %arg2: i32, %arg3: i32) -> (i32, i32, i32, i32, i32, i32) {
    %c0_i32 = arith.constant 0 : i32
    %c0_i32_0 = arith.constant 0 : i32
    %c0_i32_1 = arith.constant 0 : i32
    return %arg0, %arg2, %arg1, %arg3, %c0_i32, %c0_i32_0 : i32, i32, i32, i32, i32, i32
  }
  func.func @transform_2(%arg0: i32, %arg1: i32, %arg2: i32, %arg3: i32) -> (i32, i32, i32, i32) {
    %c2_i32 = arith.constant 2 : i32
    %0 = arith.muli %c2_i32, %arg3 : i32
    %1 = arith.addi %0, %arg2 : i32
    %c0_i32 = arith.constant 0 : i32
    %c0_i32_0 = arith.constant 0 : i32
    return %arg0, %arg1, %c0_i32, %1 : i32, i32, i32, i32
  }
}

</mosaic_0001>

<bundles_post_ra>
// kernel: spatial_shuffle_attention.1
= control target key start
LH: loop header
LB: loop body
LE: loop exit
PB: predicated region body
PF: predicated region fallthrough
CT: control target
= control target key end

     0   :  { %s1046_s9 = smov 0   ;;  %s1048_s10 = smov 0   ;;  %s1334_s0 = inlined_call_operand.vmem [shape: f32[2,4,2], index: 0, kind: input, shape index: {}]   ;;  %s1335_s1 = inlined_call_operand.vmem [shape: f32[2,2,2,2,4,256], index: 1, kind: input, shape index: {}]   ;;  %s1336_s2 = inlined_call_operand.vmem [shape: f32[2,2,4,1024], index: 2, kind: output, shape index: {}]  }
   0x1   :  { %s1050_s11 = smov 0   ;;  %s1052_s12 = smov 0  }
   0x2   :  { %s1054_s13 = smov 0   ;;  %s1056_s14 = smov 0  }
   0x3   :  { %s1058_s15 = smov 0   ;;  %s1060_s16 = smov 0  }
   0x4   :  { %s1062_s17 = smov 0  }
   0x5 LB: > { %s813_s18 = sadd.s32 4294967295, %s1025_s17   ;;  %s27_s19 = sadd.s32 1, %s1017_s15  ;;  %s1025_s17 = sphi %s1062_s17, %s12_s17   ;;  %s1021_s16 = sphi %s1060_s16, %s1356_s16   ;;  %s1017_s15 = sphi %s1058_s15, %s1355_s15   ;;  %s1013_s14 = sphi %s1056_s14, %s1354_s14   ;;  %s1009_s13 = sphi %s1054_s13, %s1353_s13   ;;  %s1005_s12 = sphi %s1052_s12, %s1352_s12   ;;  %s1001_s11 = sphi %s1050_s11, %s1351_s11   ;;  %s997_s10 = sphi %s1048_s10, %s1350_s10   ;;  %s993_s9 = sphi %s1046_s9, %s1349_s9  }
   0x6   : > { %p28_p0 = scmp.ge.s32.totalorder %s27_s19, 2  ;;  %s30_s20 = sadd.s32 1, %s1021_s16 }
   0x7   : > { %s77_s21 = sadd.s32 1, %s1005_s12  ;;  %p84_p1 = scmp.ne.s32.totalorder %s1005_s12, %s1001_s11 }
   0x8   : > { %s1358_s19 = smov (%p28_p0, %s27_s19), 0  ;;  %s1360_s20 = smov (!%p28_p0, %s30_s20), %s1021_s16 }
   0x9   : > { %s73_s22 = ssub.s32 %s1017_s15, %s1358_s19  ;;  %p85_p2 = scmp.eq.s32.totalorder %s1025_s17, 0 }
   0xa   : > { %p32_p3 = scmp.ge.s32.totalorder %s1360_s20, 2  ;;  %s815_s23 = sshll.u32 %s1017_s15, 1 }
   0xb   : > { %p1104_p4 = por %p85_p2, %p84_p1  ;;  %s101_s25 = sadd.s32 %s1021_s16, %s815_s23 }
   0xc   : > { %s1362_s20 = smov (%p32_p3, %s1360_s20), 0  ;;  %s816_s26 = sshll.u32 %s1358_s19, 1 }
   0xd   : > { %s111_s27 = sadd.s32 1, %s997_s10  ;;  %s69_s28 = ssub.s32 %s1021_s16, %s1362_s20 }
   0xe   : > { %s103_s29 = sadd.s32 %s816_s26, %s1362_s20  ;;  %s74_s30 = sor.u32 %s73_s22, %s69_s28 }
   0xf   : > { %s107_s3 = ssub.s32 %s101_s25, %s103_s29  ;;  %p75_p5 = scmp.eq.s32.totalorder %s74_s30, 0 }
  0x10   : > { %p109_p6 = scmp.eq.s32.totalorder %s107_s3, 0  ;;  %p121_p7 = scmp.ne.s32.totalorder %s997_s10, %s993_s9 }
  0x11   : > { %p122_p8 = scmp.eq.s32.totalorder %s813_s18, 3  ;;  %p818_p10 = scmp.ge.s32.totalorder %s1025_s17, 4 }
  0x12   : > { %s1119_s4 = scalar_select %p75_p5, %s1005_s12, %s77_s21  }
  0x13   : > { %s1122_s5 = scalar_select %p109_p6, %s997_s10, %s111_s27  }
  0x14   : > { %p1124_p9 = por %p122_p8, %p121_p7  ;;  %144 = sbr.rel (%p818_p10) target bundleno = 35 (0x23), region = 16 }
  0x19   : > { %154 = sbr.rel (!%p1104_p4) target bundleno = 35 (0x23), region = 24  ;;  %s156_s7 = sand.u32 (%p1104_p4), 1, %s1005_s12  }
  0x1a   : > { %s821_s8 = sshll.u32 (%p1104_p4), %s1021_s16, 3  ;;  %s819_s22 = sshll.u32 (%p1104_p4), %s156_s7, 5 }
  0x1b   : > { %s165_s18 = sadd.s32 (%p1104_p4), %s821_s8, %s815_s23  ;;  %s158_s28 = scalar_lea.vmem (%p1104_p4), [#allocation2], %s819_s22 }
  0x1c   : > { %s822_s21 = sshll.u32 (%p1104_p4), %s165_s18, 2 }
  0x1d   : > { %s169_s27 = scalar_lea.vmem (%p1104_p4), %s1335_s1, %s822_s21 }
  0x1e   : > { %v204_v0 = vld [vmem:[%s169_s27] sm:$0xff]  ;;  %v206_v1 = vld [vmem:[%s169_s27 + $0x10] sm:$0xff] }
  0x1f   : > { %v208_v2 = vld [vmem:[%s169_s27 + $0x40] sm:$0xff]  ;;  %205 = vst [vmem:[%s158_s28] sm:$0xff] %v204_v0  ;;  %v210_v3 = vld [vmem:[%s169_s27 + $0x50] sm:$0xff] }
  0x20   : > { %207 = vst [vmem:[%s158_s28 + $0x8] sm:$0xff] %v206_v1 }
  0x21   : > { %209 = vst [vmem:[%s158_s28 + $0x10] sm:$0xff] %v208_v2 }
  0x22   : > { %211 = vst [vmem:[%s158_s28 + $0x18] sm:$0xff] %v210_v3 }
  0x23 PF: > { %p823_p11 = scmp.ge.s32.totalorder %s1025_s17, 1  ;;  %p216_p12 = scmp.lt.s32.totalorder %s1025_s17, 5 }
  0x25   : > { %p217_p13 = pnand %p823_p11, %p216_p12 }
  0x26   : > { %s223_s23 = sand.u32 (!%p217_p13), 1, %s1001_s11   ;;  %p247_p0 = scmp.lt.s32.totalorder (!%p217_p13), %s1009_s13, 1 }
  0x27   : > { %220 = sbr.rel (%p217_p13) target bundleno = 373 (0x175), region = 62  ;;  %s824_s24 = sshll.u32 (!%p217_p13), %s223_s23, 5 }
  0x28   : > { %s225_s29 = scalar_lea.vmem (!%p217_p13), [#allocation2], %s824_s24  ;;  %s1027_s22 = smov (!%p217_p13), 127  }
  0x29   : > { %s244_s18 = sand.u32 (!%p217_p13), 1, %s993_s9  }
  0x2a   : > { %s825_s21 = sshll.u32 (!%p217_p13), %s244_s18, 5 }
  0x2b   : > { %s1279_s25 = scalar_lea.vmem (!%p217_p13), [#allocation3], %s825_s21 }
  0x2c   : > { %v1139_v4 = vld [vmem:[%s225_s29 + $0x10] sm:$0xff]  ;;  %v1141_v5 = vld [vmem:[%s225_s29] sm:$0xff]  ;;  %v1143_v6 = vld [vmem:[%s225_s29 + $0x18] sm:$0xff]  ;;  %vm289_vm0 = vcmask 1041408   ;;  %vm344_vm1 = vcmask 1043458   ;;  %s248_s11 = scalar_select %p247_p0, %s1009_s13, 1 }
  0x2d   : > { %274 = vst [vmem:[#allocation1 + $0x20] ss:$2 sm:$0xff] %v1139_v4  ;;  %v1146_v7 = vld [vmem:[%s225_s29 + $0x8] sm:$0xff]  ;;  %v1028_v49 = vmov 256.0   ;;  %v1029_v51 = vmov 0   ;;  %s836_s9 = sshll.u32 (%p1124_p9), %s1009_s13, 1 }
  0x2e   : > { %266 = vst [vmem:[#allocation1] ss:$2 sm:$0xff] %v1141_v5  ;;  %s826_s30 = sshll.u32 %s248_s11, 2  ;;  %921 = vrcp.f32 %v1028_v49  ;;  %920 = vset.pattern.permute.xlu2 %v1029_v51  ;;  %919 = vset.pattern.permute.xlu0 %v1029_v51  ;;  %s658_s26 = sadd.s32 (%p1124_p9), %s1013_s14, %s836_s9 }
  0x2f   : > { %278 = vst [vmem:[#allocation1 + $0x30] ss:$2 sm:$0xff] %v1143_v6  ;;  %s250_s8 = scalar_lea.vmem %s1334_s0, %s826_s30  ;;  %918 = vset.pattern.permute.xlu1 %v1029_v51  ;;  %s841_s27 = sshll.u32 (%p1124_p9), %s658_s26, 3 }
  0x30   : > { %270 = vst [vmem:[#allocation1 + $0x10] ss:$2 sm:$0xff] %v1146_v7  ;;  %v365_v48 = vld [vmem:[%s250_s8] sm:$0xf]  ;;  %s667_s24 = scalar_lea.vmem (%p1124_p9), %s1336_s2, %s841_s27 }
  0x34   : > { %v275_v8 = vld.sshfl [vmem:[#allocation1 + $0x20] sm:$0xff pattern:$0x75316420]  ;;  %v276_v9 = vld.sshfl [vmem:[#allocation1 + $0x28] sm:$0xff pattern:$0x75316420]  ;;  %v922_v50 = vpop.eup %921 }
  0x35   : > { %v300_v10 = vsel %vm289_vm0, %v275_v8, 0.0  ;;  %v301_v11 = vsel %vm289_vm0, %v276_v9, 0.0  ;;  %329 = vst [vmem:[#allocation1 + $0x20] ss:$2 sm:$0xff] %v1139_v4  ;;  %v311_v52 = vmul.f32 256.0, %v922_v50  ;;  %vm315_vm2 = vweird.f32 %v922_v50 }
  0x36   : > { %v302_v12 = vadd.f32 %v301_v11, %v300_v10  ;;  %v267_v13 = vld.sshfl [vmem:[#allocation1] sm:$0xff pattern:$0x75316420]  ;;  %v268_v14 = vld.sshfl [vmem:[#allocation1 + $0x8] sm:$0xff pattern:$0x75316420] }
  0x37   : > { %v290_v15 = vsel %vm289_vm0, %v267_v13, 0.0  ;;  %v291_v16 = vsel %vm289_vm0, %v268_v14, 0.0  ;;  %321 = vst [vmem:[#allocation1] ss:$2 sm:$0xff] %v1141_v5  ;;  %v312_v53 = vsub.f32 1.0, %v311_v52 }
  0x38   : > { %303 = vadd.xlane.f32.xlu1 %v302_v12  ;;  %v292_v17 = vadd.f32 %v291_v16, %v290_v15  ;;  %v279_v18 = vld.sshfl [vmem:[#allocation1 + $0x30] sm:$0xff pattern:$0x75316420]  ;;  %v280_v19 = vld.sshfl [vmem:[#allocation1 + $0x38] sm:$0xff pattern:$0x75316420] }
  0x39   : > { %v305_v20 = vsel %vm289_vm0, %v279_v18, 0.0  ;;  %v306_v21 = vsel %vm289_vm0, %v280_v19, 0.0  ;;  %333 = vst [vmem:[#allocation1 + $0x30] ss:$2 sm:$0xff] %v1143_v6  ;;  %v313_v56 = vmul.f32 %v922_v50, %v312_v53 }
  0x3a   : > { %293 = vadd.xlane.f32.xlu0 %v292_v17  ;;  %v271_v22 = vld.sshfl [vmem:[#allocation1 + $0x10] sm:$0xff pattern:$0x75316420]  ;;  %v272_v23 = vld.sshfl [vmem:[#allocation1 + $0x18] sm:$0xff pattern:$0x75316420]  ;;  %v307_v26 = vadd.f32 %v306_v21, %v305_v20 }
  0x3b   : > { %v295_v24 = vsel %vm289_vm0, %v271_v22, 0.0  ;;  %v296_v25 = vsel %vm289_vm0, %v272_v23, 0.0  ;;  %325 = vst [vmem:[#allocation1 + $0x10] ss:$2 sm:$0xff] %v1146_v7  ;;  %v314_v57 = vadd.f32 %v922_v50, %v313_v56 }
  0x3c   : > { %v297_v29 = vadd.f32 %v296_v25, %v295_v24  ;;  %v330_v30 = vld.sshfl [vmem:[#allocation1 + $0x20] sm:$0xff pattern:$0x75316420]  ;;  %v331_v33 = vld.sshfl [vmem:[#allocation1 + $0x28] sm:$0xff pattern:$0x75316420] }
  0x3d   : > { %v355_v43 = vsel %vm344_vm1, %v330_v30, -inf  ;;  %v356_v44 = vsel %vm344_vm1, %v331_v33, -inf  ;;  %v316_v61 = vsel %vm315_vm2, %v922_v50, %v314_v57 }
  0x3e   : > { %v322_v27 = vld.sshfl [vmem:[#allocation1] sm:$0xff pattern:$0x75316420]  ;;  %v323_v28 = vld.sshfl [vmem:[#allocation1 + $0x8] sm:$0xff pattern:$0x75316420]  ;;  %v357_v47 = vmax.f32 %v355_v43, %v356_v44 }
  0x3f   : > { %v345_v31 = vsel %vm344_vm1, %v322_v27, -inf  ;;  %v346_v32 = vsel %vm344_vm1, %v323_v28, -inf }
  0x40   : > { %v347_v34 = vmax.f32 %v345_v31, %v346_v32  ;;  %308 = vadd.xlane.f32.xlu1 %v307_v26  ;;  %v334_v35 = vld.sshfl [vmem:[#allocation1 + $0x30] sm:$0xff pattern:$0x75316420]  ;;  %v335_v36 = vld.sshfl [vmem:[#allocation1 + $0x38] sm:$0xff pattern:$0x75316420] }
  0x41   : > { %v360_v37 = vsel %vm344_vm1, %v334_v35, -inf  ;;  %v361_v38 = vsel %vm344_vm1, %v335_v36, -inf }
  0x42   : > { %348 = vmax.xlane.f32.xlu2 %v347_v34  ;;  %298 = vadd.xlane.f32.xlu0 %v297_v29  ;;  %v326_v39 = vld.sshfl [vmem:[#allocation1 + $0x10] sm:$0xff pattern:$0x75316420]  ;;  %v327_v40 = vld.sshfl [vmem:[#allocation1 + $0x18] sm:$0xff pattern:$0x75316420]  ;;  %v362_v45 = vmax.f32 %v360_v37, %v361_v38 }
  0x43   : > { %v350_v41 = vsel %vm344_vm1, %v326_v39, -inf  ;;  %v351_v42 = vsel %vm344_vm1, %v327_v40, -inf }
  0x44   : > { %v352_v46 = vmax.f32 %v350_v41, %v351_v42 }
  0x48   : > { %363 = vmax.xlane.f32.xlu1 %v362_v45 }
  0x4a   : > { %353 = vmax.xlane.f32.xlu2 %v352_v46  ;;  %358 = vmax.xlane.f32.xlu0 %v357_v47 }
  0x62   : > { %383 = vrot.lane.b32.xlu2 %v365_v48, %s1027_s22 }
  0xab   : > { %v304_v54 = vpop.xlane.xlu1 %303 }
  0xac   : > { %v319_v12 = vmul.f32 %v316_v61, %v304_v54 }
  0xad   : > { %v294_v55 = vpop.xlane.xlu0 %293 }
  0xae   : > { %v317_v62 = vmul.f32 %v316_v61, %v294_v55  ;;  %v472_v20 = vrot.slane %v319_v12, 6 }
  0xb0   : > { %v470_v3 = vrot.slane %v317_v62, 6  ;;  %v480_v33 = vmul.f32 %v472_v20, %v365_v48 }
  0xb2   : > { %v478_v15 = vmul.f32 %v470_v3, %v365_v48 }
  0xb3   : > { %v309_v58 = vpop.xlane.xlu1 %308 }
  0xb4   : > { %v320_v63 = vmul.f32 %v316_v61, %v309_v58 }
  0xb5   : > { %v349_v59 = vpop.xlane.xlu2 %348  ;;  %v299_v60 = vpop.xlane.xlu0 %298 }
  0xb6   : > { %v473_v8 = vrot.slane %v320_v63, 6  ;;  %v370_v11 = vrot.slane %v349_v59, 2  ;;  %v318_v13 = vmul.f32 %v316_v61, %v299_v60 }
  0xb8   : > { %v481_v16 = vmul.f32 %v473_v8, %v365_v48  ;;  %v378_v19 = vmul.f32 %v370_v11, %v365_v48  ;;  %v471_v21 = vrot.slane %v318_v13, 6 }
  0xba   : > { %v479_v35 = vmul.f32 %v471_v21, %v365_v48 }
  0xbb   : > { %v364_v0 = vpop.xlane.xlu1 %363 }
  0xbc   : > { %v373_v10 = vrot.slane %v364_v0, 2 }
  0xbd   : > { %v354_v1 = vpop.xlane.xlu2 %353  ;;  %v359_v2 = vpop.xlane.xlu0 %358 }
  0xbe   : > { %v372_v9 = vrot.slane %v359_v2, 2  ;;  %v371_v14 = vrot.slane %v354_v1, 2  ;;  %v381_v18 = vmul.f32 %v373_v10, %v365_v48 }
  0xc0   : > { %v380_v17 = vmul.f32 %v372_v9, %v365_v48  ;;  %v379_v22 = vmul.f32 %v371_v14, %v365_v48 }
  0xc5   : > { %v384_v23 = vpop.permute.xlu2 %383 }
  0xc6   : > { %v386_v24 = vadd.f32 %v384_v23, %v378_v19  ;;  %v482_v25 = vadd.f32 %v478_v15, %v384_v23  ;;  %v388_v26 = vadd.f32 %v384_v23, %v380_v17  ;;  %v485_v27 = vadd.f32 %v481_v16, %v384_v23 }
  0xc7   : > { %v387_v28 = vadd.f32 %v384_v23, %v379_v22  ;;  %v389_v29 = vadd.f32 %v384_v23, %v381_v18  ;;  %v484_v38 = vadd.f32 %v480_v33, %v384_v23  ;;  %v483_v39 = vadd.f32 %v479_v35, %v384_v23 }
  0xc8   : > { %v827_v30 = vmul.f32 -1.442695, %v386_v24  ;;  %v831_v31 = vmul.f32 -1.442695, %v482_v25  ;;  %v829_v32 = vmul.f32 -1.442695, %v388_v26 }
  0xc9   : > { %v834_v34 = vmul.f32 -1.442695, %v485_v27  ;;  %v828_v36 = vmul.f32 -1.442695, %v387_v28  ;;  %v830_v37 = vmul.f32 -1.442695, %v389_v29 }
  0xca   : > { %923 = vpow2.f32 %v827_v30  ;;  %v833_v43 = vmul.f32 -1.442695, %v484_v38  ;;  %v832_v46 = vmul.f32 -1.442695, %v483_v39 }
  0xcb   : > { %925 = vpow2.f32 %v831_v31 }
  0xcc   : > { %927 = vpow2.f32 %v829_v32 }
  0xcd   : > { %929 = vpow2.f32 %v834_v34 }
  0xce   : > { %931 = vpow2.f32 %v828_v36 }
  0xcf   : > { %933 = vpow2.f32 %v830_v37 }
  0xd0   : > { %v924_v40 = vpop.eup %923 }
  0xd1   : > { %v926_v41 = vpop.eup %925  ;;  %v402_v42 = vadd.f32 1.0, %v924_v40 }
  0xd2   : > { %v928_v44 = vpop.eup %927  ;;  %v1176_v45 = vadd.f32 1.0, %v926_v41 }
  0xd3   : > { %v930_v47 = vpop.eup %929  ;;  %935 = vrcp.f32 %v402_v42  ;;  %v1179_v50 = vadd.f32 1.0, %v928_v44  ;;  %v415_v53 = vand.u32 2147483647, %v402_v42  ;;  %v417_v54 = vand.u32 2147483648, %v402_v42 }
  0xd4   : > { %v932_v48 = vpop.eup %931  ;;  %937 = vrcp.f32 %v1176_v45  ;;  %v1181_v51 = vadd.f32 1.0, %v930_v47  ;;  %v511_v55 = vand.u32 2147483647, %v1176_v45  ;;  %v513_v58 = vand.u32 2147483648, %v1176_v45 }
  0xd5   : > { %v934_v49 = vpop.eup %933  ;;  %939 = vpow2.f32 %v833_v43  ;;  %v1183_v52 = vadd.f32 1.0, %v932_v48  ;;  %vm411_vm3 = vweird.f32 %v402_v42  ;;  %vm507_vm4 = vweird.f32 %v1176_v45 }
  0xd6   : > { %941 = vpow2.f32 %v832_v46  ;;  %v1188_v56 = vadd.f32 1.0, %v934_v49  ;;  %vm1193_vm5 = vcmp.eq.f32.partialorder %v415_v53, 8.507059e+37  ;;  %v418_v63 = vor.u32 1.1754944e-38, %v417_v54 }
  0xd7   : > { %943 = vrcp.f32 %v1179_v50  ;;  %v445_v1 = vand.u32 2147483647, %v1179_v50  ;;  %vm1199_vm6 = vcmp.eq.f32.partialorder %v511_v55, 8.507059e+37  ;;  %v447_v9 = vand.u32 2147483648, %v1179_v50 }
  0xd8   : > { %945 = vrcp.f32 %v1181_v51  ;;  %v514_v12 = vor.u32 1.1754944e-38, %v513_v58  ;;  %vm441_vm7 = vweird.f32 %v1179_v50  ;;  %v556_v13 = vand.u32 2147483647, %v1181_v51 }
  0xd9   : > { %v936_v57 = vpop.eup %935  ;;  %947 = vrcp.f32 %v1183_v52  ;;  %vm552_vm9 = vweird.f32 %v1181_v51  ;;  %v558_v17 = vand.u32 2147483648, %v1181_v51  ;;  %vm1214_vm11 = vcmp.eq.f32.partialorder %v445_v1, 8.507059e+37 }
  0xda   : > { %v938_v59 = vpop.eup %937  ;;  %v407_v60 = vmul.f32 %v936_v57, %v402_v42  ;;  %949 = vrcp.f32 %v1188_v56  ;;  %vm412_vm8 = vweird.f32 %v936_v57  ;;  %v448_v24 = vor.u32 1.1754944e-38, %v447_v9 }
  0xdb   : > { %v940_v61 = vpop.eup %939  ;;  %v503_v0 = vmul.f32 %v938_v59, %v1176_v45  ;;  %vm508_vm10 = vweird.f32 %v938_v59  ;;  %vm413_vm12 = vmor %vm411_vm3, %vm412_vm8  ;;  %vm426_vm2 = vweird.f32 %v1183_v52  ;;  %v432_v45 = vand.u32 2147483648, %v1183_v52 }
  0xdc   : > { %v942_v2 = vpop.eup %941  ;;  %v408_v3 = vsub.f32 1.0, %v407_v60  ;;  %v1223_v28 = vadd.f32 1.0, %v940_v61  ;;  %vm509_vm14 = vmor %vm507_vm4, %vm508_vm10  ;;  %v430_v48 = vand.u32 2147483647, %v1183_v52  ;;  %v460_v58 = vand.u32 2147483647, %v1188_v56 }
  0xdd   : > { %v944_v10 = vpop.eup %943  ;;  %v504_v11 = vsub.f32 1.0, %v503_v0  ;;  %v1227_v33 = vadd.f32 1.0, %v942_v2 }
  0xde   : > { %v1207_v14 = vpop.eup %945  ;;  %v409_v15 = vmul.f32 %v936_v57, %v408_v3  ;;  %v437_v16 = vmul.f32 %v944_v10, %v1179_v50  ;;  %vm442_vm13 = vweird.f32 %v944_v10  ;;  %951 = vrcp.f32 %v1223_v28 }
  0xdf   : > { %v1212_v18 = vpop.eup %947  ;;  %v505_v19 = vmul.f32 %v938_v59, %v504_v11  ;;  %v548_v21 = vmul.f32 %v1207_v14, %v1181_v51  ;;  %vm553_vm15 = vweird.f32 %v1207_v14  ;;  %vm443_vm0 = vmor %vm441_vm7, %vm442_vm13  ;;  %953 = vrcp.f32 %v1227_v33 }
  0xe0   : > { %v410_v22 = vadd.f32 %v936_v57, %v409_v15  ;;  %v438_v23 = vsub.f32 1.0, %v437_v16  ;;  %v422_v25 = vmul.f32 %v1212_v18, %v1183_v52  ;;  %v950_v29 = vpop.eup %949  ;;  %vm427_vm1 = vweird.f32 %v1212_v18  ;;  %vm1250_vm3 = vmor %vm552_vm9, %vm553_vm15 }
  0xe1   : > { %v506_v26 = vadd.f32 %v938_v59, %v505_v19  ;;  %v549_v27 = vsub.f32 1.0, %v548_v21  ;;  %v452_v37 = vmul.f32 %v950_v29, %v1188_v56  ;;  %vm1259_vm4 = vmor %vm426_vm2, %vm427_vm1  ;;  %v559_v51 = vor.u32 1.1754944e-38, %v558_v17 }
  0xe2   : > { %v414_v30 = vsel %vm413_vm12, %v936_v57, %v410_v22  ;;  %v439_v31 = vmul.f32 %v944_v10, %v438_v23  ;;  %v423_v32 = vsub.f32 1.0, %v422_v25  ;;  %v462_v52 = vand.u32 2147483648, %v1188_v56 }
  0xe3   : > { %v419_v34 = vsel %vm1193_vm5, %v418_v63, %v414_v30  ;;  %v510_v35 = vsel %vm509_vm14, %v938_v59, %v506_v26  ;;  %v550_v36 = vmul.f32 %v1207_v14, %v549_v27  ;;  %v453_v42 = vsub.f32 1.0, %v452_v37 }
  0xe4   : > { %564 = vperm.xlu0 %919, %v419_v34   ;;  %v515_v38 = vsel %vm1199_vm6, %v514_v12, %v510_v35  ;;  %v440_v39 = vadd.f32 %v944_v10, %v439_v31  ;;  %v424_v40 = vmul.f32 %v1212_v18, %v423_v32  ;;  %vm457_vm5 = vweird.f32 %v950_v29  ;;  %v952_v59 = vpop.eup %951 }
  0xe5   : > { %608 = vperm.xlu1 %918, %v515_v38   ;;  %v551_v41 = vadd.f32 %v1207_v14, %v550_v36  ;;  %v454_v49 = vmul.f32 %v950_v29, %v453_v42  ;;  %vm557_vm6 = vcmp.eq.f32.partialorder %v556_v13, 8.507059e+37  ;;  %v433_v57 = vor.u32 1.1754944e-38, %v432_v45  ;;  %v954_v0 = vpop.eup %953 }
  0xe6   : > { %v444_v43 = vsel %vm443_vm0, %v944_v10, %v440_v39  ;;  %v425_v44 = vadd.f32 %v1212_v18, %v424_v40  ;;  %vm456_vm7 = vweird.f32 %v1188_v56  ;;  %vm431_vm8 = vcmp.eq.f32.partialorder %v430_v48, 8.507059e+37 }
  0xe7   : > { %v449_v46 = vsel %vm1214_vm11, %v448_v24, %v444_v43  ;;  %v555_v50 = vsel %vm1250_vm3, %v1207_v14, %v551_v41  ;;  %v455_v55 = vadd.f32 %v950_v29, %v454_v49  ;;  %vm458_vm9 = vmor %vm456_vm7, %vm457_vm5  ;;  %v533_v63 = vmul.f32 %v952_v59, %v1223_v28 }
  0xe8   : > { %572 = vperm.xlu2 %920, %v449_v46   ;;  %v429_v54 = vsel %vm1259_vm4, %v1212_v18, %v425_v44  ;;  %v560_v60 = vsel %vm557_vm6, %v559_v51, %v555_v50  ;;  %v463_v1 = vor.u32 1.1754944e-38, %v462_v52  ;;  %vm461_vm10 = vcmp.eq.f32.partialorder %v460_v58, 8.507059e+37 }
  0xe9   : > { %v434_v61 = vsel %vm431_vm8, %v433_v57, %v429_v54  ;;  %v459_v62 = vsel %vm458_vm9, %v950_v29, %v455_v55  ;;  %v534_v2 = vsub.f32 1.0, %v533_v63  ;;  %v518_v3 = vmul.f32 %v954_v0, %v1227_v33 }
  0xea   : > { %v464_v8 = vsel %vm461_vm10, %v463_v1, %v459_v62  ;;  %v543_v9 = vand.u32 2147483648, %v1223_v28  ;;  %vm538_vm11 = vweird.f32 %v952_v59  ;;  %v541_v10 = vand.u32 2147483647, %v1223_v28 }
  0xeb   : > { %v535_v56 = vmul.f32 %v952_v59, %v534_v2  ;;  %v519_v11 = vsub.f32 1.0, %v518_v3  ;;  %vm537_vm12 = vweird.f32 %v1223_v28  ;;  %v528_v12 = vand.u32 2147483648, %v1227_v33 }
  0xec   : > { %620 = vperm.xlu0 %919, %v560_v60   ;;  %vm523_vm13 = vweird.f32 %v954_v0  ;;  %v526_v15 = vand.u32 2147483647, %v1227_v33  ;;  %vm539_vm14 = vmor %vm537_vm12, %vm538_vm11  ;;  %v544_v16 = vor.u32 1.1754944e-38, %v543_v9  ;;  %vm542_vm15 = vcmp.eq.f32.partialorder %v541_v10, 8.507059e+37 }
  0xed   : > { %568 = vperm.xlu1 %918, %v434_v61   ;;  %v536_v13 = vadd.f32 %v952_v59, %v535_v56  ;;  %v520_v14 = vmul.f32 %v954_v0, %v519_v11  ;;  %vm522_vm0 = vweird.f32 %v1227_v33  ;;  %v529_v20 = vor.u32 1.1754944e-38, %v528_v12 }
  0xee   : > { %vm524_vm1 = vmor %vm522_vm0, %vm523_vm13  ;;  %vm527_vm2 = vcmp.eq.f32.partialorder %v526_v15, 8.507059e+37  ;;  %v1030_v23 = vmov 839922192  }
  0xef   : > { %v540_v17 = vsel %vm539_vm14, %v952_v59, %v536_v13  ;;  %v521_v18 = vadd.f32 %v954_v0, %v520_v14  ;;  %v579_v24 = vunpack.c.l.s4 %v1030_v23 }
  0xf0   : > { %576 = vperm.xlu2 %920, %v464_v8   ;;  %v545_v19 = vsel %vm542_vm15, %v544_v16, %v540_v17 }
  0xf1   : > { %v525_v21 = vsel %vm524_vm1, %v954_v0, %v521_v18  ;;  %v580_v25 = vunpack.c.0.s8 %v579_v24 }
  0xf2   : > { %v530_v22 = vsel %vm527_vm2, %v529_v20, %v525_v21 }
  0xf5   : > { %616 = vperm.xlu1 %918, %v545_v19  }
  0xf8   : > { %612 = vperm.xlu2 %920, %v530_v22  }
 0x142   : > { %v573_v26 = vpop.permute.xlu2 %572 }
 0x143   : > { %v589_v27 = vperm.slane %v573_v26, %v580_v25 }
 0x145   : > { %v600_v28 = vmul.f32 %v589_v27, %v1139_v4 }
 0x147   : > { %604 = vst [vmem:[%s1279_s25 + $0x10] sm:$0x33] %v600_v28 }
 0x14a   : > { %v577_v29 = vpop.permute.xlu2 %576 }
 0x14b   : > { %v593_v30 = vperm.slane %v577_v29, %v580_v25 }
 0x14d   : > { %v601_v31 = vmul.f32 %v593_v30, %v1143_v6 }
 0x14f   : > { %605 = vst [vmem:[%s1279_s25 + $0x18] sm:$0x33] %v601_v31 }
 0x152   : > { %v613_v32 = vpop.permute.xlu2 %612 }
 0x153   : > { %v629_v33 = vperm.slane %v613_v32, %v580_v25 }
 0x155   : > { %v643_v34 = vmul.f32 %v629_v33, %v1146_v7 }
 0x156   : > { %v565_v35 = vpop.permute.xlu0 %564 }
 0x157   : > { %647 = vst [vmem:[%s1279_s25 + $0x8] sm:$0xcc] %v643_v34  ;;  %v609_v36 = vpop.permute.xlu1 %608  ;;  %v581_v37 = vperm.slane %v565_v35, %v580_v25 }
 0x158   : > { %v625_v38 = vperm.slane %v609_v36, %v580_v25 }
 0x159   : > { %v598_v39 = vmul.f32 %v581_v37, %v1141_v5 }
 0x15a   : > { %v642_v40 = vmul.f32 %v625_v38, %v1141_v5 }
 0x15b   : > { %602 = vst [vmem:[%s1279_s25] sm:$0x33] %v598_v39 }
 0x15c   : > { %646 = vst [vmem:[%s1279_s25] sm:$0xcc] %v642_v40 }
 0x15e   : > { %v621_v41 = vpop.permute.xlu0 %620 }
 0x15f   : > { %v569_v42 = vpop.permute.xlu1 %568  ;;  %v637_v43 = vperm.slane %v621_v41, %v580_v25 }
 0x160   : > { %v585_v44 = vperm.slane %v569_v42, %v580_v25 }
 0x161   : > { %v645_v45 = vmul.f32 %v637_v43, %v1143_v6 }
 0x162   : > { %v599_v46 = vmul.f32 %v585_v44, %v1146_v7 }
 0x163   : > { %649 = vst [vmem:[%s1279_s25 + $0x18] sm:$0xcc] %v645_v45  ;;  %v702_v5 = vld [vmem:[%s1279_s25] sm:$0xff] (%p1124_p9) }
 0x164   : > { %603 = vst [vmem:[%s1279_s25 + $0x8] sm:$0x33] %v599_v46 }
 0x165   : > { %703 = vst [vmem:[%s667_s24] sm:$0xff] (%p1124_p9), %v702_v5 }
 0x167   : > { %v617_v47 = vpop.permute.xlu1 %616 }
 0x168   : > { %v633_v48 = vperm.slane %v617_v47, %v580_v25  ;;  %656 = sbr.rel (!%p1124_p9) target bundleno = 373 (0x175), region = 70 }
 0x16a   : > { %v644_v49 = vmul.f32 %v633_v48, %v1139_v4  ;;  %v708_v7 = vld [vmem:[%s1279_s25 + $0x18] sm:$0xff] (%p1124_p9) }
 0x16b   : > { %v704_v6 = vld [vmem:[%s1279_s25 + $0x8] sm:$0xff] (%p1124_p9)  ;;  %709 = vst [vmem:[%s667_s24 + $0x60] sm:$0xff] (%p1124_p9), %v708_v7 }
 0x16c   : > { %648 = vst [vmem:[%s1279_s25 + $0x10] sm:$0xcc] %v644_v49 }
 0x16d   : > { %705 = vst [vmem:[%s667_s24 + $0x20] sm:$0xff] %v704_v6 }
 0x173   : > { %v706_v4 = vld [vmem:[%s1279_s25 + $0x10] sm:$0xff] }
 0x174   : > { %707 = vst [vmem:[%s667_s24 + $0x40] sm:$0xff] %v706_v4 }
 0x175 PF: > { %s12_s17 = sadd.s32 1, %s1025_s17   ;;  %s1349_s9 = smov %s997_s10 }
 0x176   : > { %p9_p1 = scmp.ge.s32.totalorder %s12_s17, 6   ;;  %s1350_s10 = smov %s1122_s5 }
 0x177   : > { %s1351_s11 = smov %s1005_s12  ;;  %s1352_s12 = smov %s1119_s4 }
 0x178   : > { %s1353_s13 = smov %s1017_s15  ;;  %s1354_s14 = smov %s1021_s16 }
 0x179   : > { %s1355_s15 = smov %s1358_s19  ;;  %s1356_s16 = smov %s1362_s20 }
 0x17a   :  { %11 = sbr.rel (!%p9_p1) target bundleno = 5 (0x5), region = 148 }

</bundles_post_ra>
